<compile_context>
chip_gen: v7x
topology: tpu7x:2x2x1
jax: 0.10.0
libtpu: 0.0.40
codegen_flags: <defaults>
</compile_context>

<pallas_src>
import jax
import jax.numpy as jnp
from jax.experimental import pallas as pl
from jax.experimental.pallas import tpu as pltpu


def _round_up(x, m):
    return ((x + m - 1) // m) * m


def _encoder_kernel(f_ref, r_ref, w1_ref, b1_ref, w2_ref, b2_ref, o_ref):
    # f_ref, r_ref : (tb, F)  activations in their original dtype (f32)
    # w1_ref       : (2F, E)  W1^T (resident across the grid), f32 or bf16
    # b1_ref       : (1, E)   f32
    # w2_ref       : (E, Z)   W2^T (resident), f32 or bf16
    # b2_ref       : (1, Z)   f32
    # o_ref        : (tb, Z)
    #
    # VMEM-level lane concat: cat([f, r], 1) never touches HBM, and layer 1
    # becomes a single dense K=2F matmul (one MXU push chain instead of two).
    x = jnp.concatenate([f_ref[...], r_ref[...]], axis=-1)
    # Cast to the MXU dtype *inside* the kernel -> zero extra HBM traffic.
    x = x.astype(w1_ref.dtype)
    h = jnp.dot(x, w1_ref[...], preferred_element_type=jnp.float32)
    # Bias add + tanh stay f32 on VPU/EUP (v5e has no bf16 VPU/EUP).
    h = jnp.tanh(h + b1_ref[...])
    out = jnp.dot(h.astype(w2_ref.dtype), w2_ref[...],
                  preferred_element_type=jnp.float32)
    o_ref[...] = (out + b2_ref[...]).astype(o_ref.dtype)


def prepare_params(params, *, use_bf16=True):
    """One-time parameter preparation (hoisted out of the per-call path).

    params: dict with w1t [2F, E], b1 [E], w2t [E, Z], b2 [Z] (f32).
    Returns weights cast to the MXU dtype and biases reshaped to (1, dim) f32.
    """
    mxu_dtype = jnp.bfloat16 if use_bf16 else params["w1t"].dtype
    E = params["w1t"].shape[1]
    Z = params["w2t"].shape[1]
    return {
        "w1t": params["w1t"].astype(mxu_dtype),                 # (2F, E)
        "b1": params["b1"].reshape(1, E).astype(jnp.float32),   # (1, E)
        "w2t": params["w2t"].astype(mxu_dtype),                 # (E, Z)
        "b2": params["b2"].reshape(1, Z).astype(jnp.float32),   # (1, Z)
    }


def encoder_forward(features, reference_features, prepared, *, tb=None):
    """Pallas implementation of Encoder.forward.

    features, reference_features: [B, F] float32
    prepared: output of prepare_params().
    """
    # dropout_input has p=0.0 -> identity (exact match with PyTorch eval/train).
    B, F = features.shape
    out_dtype = features.dtype

    w1t, b1 = prepared["w1t"], prepared["b1"]
    w2t, b2 = prepared["w2t"], prepared["b2"]
    twoF, E = w1t.shape
    Z = w2t.shape[1]
    assert twoF == 2 * F, "w1t must have shape (2*F, E)"

    # Batch tile selection:
    #  * big tiles amortize the ~0.35us per-grid-step pipeline overhead,
    #  * >= 4 grid steps for large B so the "parallel" axis can be sharded
    #    across both v7x TensorCores,
    #  * cap at 4096 rows -> double-buffered f32 inputs + f32 intermediates stay
    #    well under the 32 MiB scoped-VMEM default (v7x has only 64 MiB total).
    if tb is None:
        tb = min(4096, max(8, _round_up(pl.cdiv(B, 4), 8)))
    tb = max(8, _round_up(int(tb), 8))

    grid = (pl.cdiv(B, tb),)  # ragged last tile handled by masked output stores

    in_itemsize = jnp.dtype(features.dtype).itemsize
    w_itemsize = jnp.dtype(w1t.dtype).itemsize
    cost = pl.CostEstimate(
        flops=2 * B * (2 * F * E + E * Z),
        transcendentals=B * E,
        bytes_accessed=(2 * B * F * in_itemsize
                        + (w1t.size + w2t.size) * w_itemsize
                        + (b1.size + b2.size) * 4
                        + B * Z * jnp.dtype(out_dtype).itemsize),
    )

    return pl.pallas_call(
        _encoder_kernel,
        out_shape=jax.ShapeDtypeStruct((B, Z), out_dtype),
        grid_spec=pltpu.PrefetchScalarGridSpec(
            num_scalar_prefetch=0,
            grid=grid,
            in_specs=[
                pl.BlockSpec((tb, F), lambda i: (i, 0)),     # features tile
                pl.BlockSpec((tb, F), lambda i: (i, 0)),     # reference tile
                pl.BlockSpec((twoF, E), lambda i: (0, 0)),   # W1^T (resident)
                pl.BlockSpec((1, E), lambda i: (0, 0)),      # b1
                pl.BlockSpec((E, Z), lambda i: (0, 0)),      # W2^T (resident)
                pl.BlockSpec((1, Z), lambda i: (0, 0)),      # b2
            ],
            out_specs=pl.BlockSpec((tb, Z), lambda i: (i, 0)),
        ),
        compiler_params=pltpu.CompilerParams(
            dimension_semantics=("parallel",),
        ),
        cost_estimate=cost,
    )(features, reference_features, w1t, b1, w2t, b2)


def init_params(key, feature_dim, encoder_size0, z_dim):
    """Deterministic init mimicking PyTorch nn.Linear default (U[-1/sqrt(fan_in), +])."""
    k1, k2, k3, k4 = jax.random.split(key, 4)
    fan1 = 2 * feature_dim
    fan2 = encoder_size0
    lim1 = 1.0 / jnp.sqrt(fan1)
    lim2 = 1.0 / jnp.sqrt(fan2)
    w1t = jax.random.uniform(k1, (fan1, encoder_size0), jnp.float32, -lim1, lim1)
    b1 = jax.random.uniform(k2, (encoder_size0,), jnp.float32, -lim1, lim1)
    w2t = jax.random.uniform(k3, (encoder_size0, z_dim), jnp.float32, -lim2, lim2)
    b2 = jax.random.uniform(k4, (z_dim,), jnp.float32, -lim2, lim2)
    return {"w1t": w1t, "b1": b1, "w2t": w2t, "b2": b2}


def _reference(features, reference_features, params):
    x = jnp.concatenate([features, reference_features], axis=1)
    return jnp.tanh(x @ params["w1t"] + params["b1"]) @ params["w2t"] + params["b2"]


if __name__ == "__main__":
    # Small shapes consistent with the module's forward:
    # feature_dim=64, encoder_size=[256], z_dim=16.
    feature_dim = 64
    encoder_size0 = 256
    z_dim = 16

    key = jax.random.PRNGKey(0)
    kf, kr, kp = jax.random.split(key, 3)
    params = init_params(kp, feature_dim, encoder_size0, z_dim)

    prepared_f32 = prepare_params(params, use_bf16=False)
    prepared_bf16 = prepare_params(params, use_bf16=True)

    fwd = jax.jit(encoder_forward, static_argnames=("tb",))

    # Case 1: tiny batch (single block), f32 weights.
    batch = 8
    features = jax.random.normal(kf, (batch, feature_dim), jnp.float32)
    reference_features = jax.random.normal(kr, (batch, feature_dim), jnp.float32)
    out = jax.block_until_ready(fwd(features, reference_features, prepared_f32))
    ref = _reference(features, reference_features, params)
    assert out.shape == (batch, z_dim)
    assert jnp.allclose(out, ref, atol=1e-4, rtol=1e-4)

    # Case 2: batch not divisible by the tile -> 4 parallel grid steps with a
    # ragged (masked) last tile, no wrapper-side padding or slicing.
    batch2 = 200
    f2 = jax.random.normal(jax.random.fold_in(kf, 1), (batch2, feature_dim), jnp.float32)
    r2 = jax.random.normal(jax.random.fold_in(kr, 1), (batch2, feature_dim), jnp.float32)
    out2 = jax.block_until_ready(fwd(f2, r2, prepared_f32))
    ref2 = _reference(f2, r2, params)
    assert out2.shape == (batch2, z_dim)
    assert jnp.allclose(out2, ref2, atol=1e-4, rtol=1e-4)

    # Case 3: default bf16 MXU path (in-kernel cast, f32 accumulation / bias /
    # tanh), explicit tb=128 -> 2 grid steps, partial last tile.
    out3 = jax.block_until_ready(fwd(f2, r2, prepared_bf16, tb=128))
    assert out3.shape == (batch2, z_dim)
    assert jnp.allclose(out3, ref2, atol=1e-1, rtol=1e-1)

    print("KERNEL_OK")
</pallas_src>

<mosaic_0001>
module attributes {stable_mosaic.version = 11 : i64} {
  func.func @_encoder_kernel(%arg0: i32, %arg1: memref<8x64xf32, #tpu.memory_space<vmem>>, %arg2: memref<8x64xf32, #tpu.memory_space<vmem>>, %arg3: memref<128x256xf32, #tpu.memory_space<vmem>>, %arg4: memref<1x256xf32, #tpu.memory_space<vmem>>, %arg5: memref<256x16xf32, #tpu.memory_space<vmem>>, %arg6: memref<1x16xf32, #tpu.memory_space<vmem>>, %arg7: memref<8x16xf32, #tpu.memory_space<vmem>>) attributes {dimension_semantics = [#tpu.dimension_semantics<parallel>], iteration_bounds = array<i64: 1>, scalar_prefetch = 0 : i64, scratch_operands = 0 : i64, tpu.core_type = #tpu.core_type<tc>, window_params = [{transform_indices = @transform_0, window_bounds = array<i64: 8, 64>}, {transform_indices = @transform_1, window_bounds = array<i64: 8, 64>}, {pipeline_mode = #tpu.pipeline_mode<synchronous>, transform_indices = @transform_2, window_bounds = array<i64: 128, 256>}, {pipeline_mode = #tpu.pipeline_mode<synchronous>, transform_indices = @transform_3, window_bounds = array<i64: 1, 256>}, {pipeline_mode = #tpu.pipeline_mode<synchronous>, transform_indices = @transform_4, window_bounds = array<i64: 256, 16>}, {pipeline_mode = #tpu.pipeline_mode<synchronous>, transform_indices = @transform_5, window_bounds = array<i64: 1, 16>}, {transform_indices = @transform_6, window_bounds = array<i64: 8, 16>}]} {
    %c0 = arith.constant 0 : index
    %c0_0 = arith.constant 0 : index
    %0 = vector.load %arg1[%c0, %c0_0] : memref<8x64xf32, #tpu.memory_space<vmem>>, vector<8x64xf32>
    %c0_1 = arith.constant 0 : index
    %c0_2 = arith.constant 0 : index
    %1 = vector.load %arg2[%c0_1, %c0_2] : memref<8x64xf32, #tpu.memory_space<vmem>>, vector<8x64xf32>
    %2 = tpu.concatenate %0, %1 in 1 : vector<8x64xf32>, vector<8x64xf32> -> vector<8x128xf32>
    %c0_3 = arith.constant 0 : index
    %c0_4 = arith.constant 0 : index
    %3 = vector.load %arg3[%c0_3, %c0_4] : memref<128x256xf32, #tpu.memory_space<vmem>>, vector<128x256xf32>
    %cst = arith.constant dense<0.000000e+00> : vector<8x256xf32>
    %4 = tpu.matmul %2, %3, %cst {dimension_numbers = #tpu.dot_dimension_numbers<[1], [0], [0], [1], [0, 0, 1, 1], [], []>} : vector<8x128xf32>, vector<128x256xf32>, vector<8x256xf32> -> vector<8x256xf32>
    %c0_5 = arith.constant 0 : index
    %c0_6 = arith.constant 0 : index
    %5 = vector.load %arg4[%c0_5, %c0_6] : memref<1x256xf32, #tpu.memory_space<vmem>>, vector<1x256xf32>
    %6 = vector.broadcast %5 : vector<1x256xf32> to vector<8x256xf32>
    %7 = arith.addf %4, %6 : vector<8x256xf32>
    %8 = math.tanh %7 : vector<8x256xf32>
    %c0_7 = arith.constant 0 : index
    %c0_8 = arith.constant 0 : index
    %9 = vector.load %arg5[%c0_7, %c0_8] : memref<256x16xf32, #tpu.memory_space<vmem>>, vector<256x16xf32>
    %cst_9 = arith.constant dense<0.000000e+00> : vector<8x16xf32>
    %10 = tpu.matmul %8, %9, %cst_9 {dimension_numbers = #tpu.dot_dimension_numbers<[1], [0], [0], [1], [0, 0, 1, 1], [], []>} : vector<8x256xf32>, vector<256x16xf32>, vector<8x16xf32> -> vector<8x16xf32>
    %c0_10 = arith.constant 0 : index
    %c0_11 = arith.constant 0 : index
    %11 = vector.load %arg6[%c0_10, %c0_11] : memref<1x16xf32, #tpu.memory_space<vmem>>, vector<1x16xf32>
    %12 = vector.broadcast %11 : vector<1x16xf32> to vector<8x16xf32>
    %13 = arith.addf %10, %12 : vector<8x16xf32>
    %c0_12 = arith.constant 0 : index
    %c0_13 = arith.constant 0 : index
    %14 = vector.load %arg7[%c0_12, %c0_13] : memref<8x16xf32, #tpu.memory_space<vmem>>, vector<8x16xf32>
    tpu.vector_store %arg7[%c0_12, %c0_13], %13 {strides = array<i32>} : memref<8x16xf32, #tpu.memory_space<vmem>>, vector<8x16xf32>,
    return
  }
  func.func @transform_0(%arg0: i32) -> (i32, i32) {
    %c0_i32 = arith.constant 0 : i32
    %c0_i32_0 = arith.constant 0 : i32
    return %arg0, %c0_i32 : i32, i32
  }
  func.func @transform_1(%arg0: i32) -> (i32, i32) {
    %c0_i32 = arith.constant 0 : i32
    %c0_i32_0 = arith.constant 0 : i32
    return %arg0, %c0_i32 : i32, i32
  }
  func.func @transform_2(%arg0: i32) -> (i32, i32) {
    %c0_i32 = arith.constant 0 : i32
    %c0_i32_0 = arith.constant 0 : i32
    %c0_i32_1 = arith.constant 0 : i32
    return %c0_i32, %c0_i32_0 : i32, i32
  }
  func.func @transform_3(%arg0: i32) -> (i32, i32) {
    %c0_i32 = arith.constant 0 : i32
    %c0_i32_0 = arith.constant 0 : i32
    %c0_i32_1 = arith.constant 0 : i32
    return %c0_i32, %c0_i32_0 : i32, i32
  }
  func.func @transform_4(%arg0: i32) -> (i32, i32) {
    %c0_i32 = arith.constant 0 : i32
    %c0_i32_0 = arith.constant 0 : i32
    %c0_i32_1 = arith.constant 0 : i32
    return %c0_i32, %c0_i32_0 : i32, i32
  }
  func.func @transform_5(%arg0: i32) -> (i32, i32) {
    %c0_i32 = arith.constant 0 : i32
    %c0_i32_0 = arith.constant 0 : i32
    %c0_i32_1 = arith.constant 0 : i32
    return %c0_i32, %c0_i32_0 : i32, i32
  }
  func.func @transform_6(%arg0: i32) -> (i32, i32) {
    %c0_i32 = arith.constant 0 : i32
    %c0_i32_0 = arith.constant 0 : i32
    return %arg0, %c0_i32 : i32, i32
  }
}

</mosaic_0001>

<bundles_post_ra>
// kernel: encoder_forward.1
= control target key start
LH: loop header
LB: loop body
LE: loop exit
PB: predicated region body
PF: predicated region fallthrough
CT: control target
= control target key end

     0   :  { %s405_s27 = smov 64   ;;  %v406_v7 = vmov 0.0   ;;  %s659_s0 = inlined_call_operand.vmem [shape: f32[8,64], index: 0, kind: input, shape index: {}]   ;;  %s660_s1 = inlined_call_operand.vmem [shape: f32[8,64], index: 1, kind: input, shape index: {}]   ;;  %s661_s2 = inlined_call_operand.vmem [shape: f32[128,256], index: 2, kind: input, shape index: {}]   ;;  %s662_s3 = inlined_call_operand.vmem [shape: f32[1,256], index: 3, kind: input, shape index: {}]   ;;  %s663_s4 = inlined_call_operand.vmem [shape: f32[256,16], index: 4, kind: input, shape index: {}]   ;;  %s664_s5 = inlined_call_operand.vmem [shape: f32[1,16], index: 5, kind: input, shape index: {}]   ;;  %s665_s6 = inlined_call_operand.hbm [shape: f32[8,16], index: 6, kind: output, shape index: {}]  }
   0x1   :  { %v25_v0 = vld [vmem:[%s660_s1] sm:$0xff]  ;;  %v33_v1 = vld [vmem:[%s661_s2 + $0x8] sm:$0xff]  ;;  %v35_v2 = vld [vmem:[%s661_s2 + $0x18] sm:$0xff]  ;;  %140 = vmatprep.mubr.f32.mxu0 %v406_v7 }
   0x2   :  { %27 = vrot.lane.b32.xlu0 %v25_v0, %s405_s27  ;;  %v310_v3 = vpack.c.bf16 %v35_v2, %v33_v1  ;;  %v32_v4 = vld [vmem:[%s661_s2] sm:$0xff]  ;;  %v34_v5 = vld [vmem:[%s661_s2 + $0x10] sm:$0xff]  ;;  %v37_v6 = vld [vmem:[%s661_s2 + $0x28] sm:$0xff] }
   0x3   :  { %v312_v8 = vpack.c.bf16 %v34_v5, %v32_v4  ;;  %v39_v9 = vld [vmem:[%s661_s2 + $0x38] sm:$0xff]  ;;  %v36_v10 = vld [vmem:[%s661_s2 + $0x20] sm:$0xff]  ;;  %v38_v11 = vld [vmem:[%s661_s2 + $0x30] sm:$0xff] }
   0x4   :  { %311 = vmatprep.subr.bf16.mxu0 %v310_v3  ;;  %v314_v12 = vpack.c.bf16 %v39_v9, %v37_v6  ;;  %v41_v13 = vld [vmem:[%s661_s2 + $0x48] sm:$0xff]  ;;  %v43_v14 = vld [vmem:[%s661_s2 + $0x58] sm:$0xff]  ;;  %v316_v15 = vpack.c.bf16 %v38_v11, %v36_v10  ;;  %v40_v17 = vld [vmem:[%s661_s2 + $0x40] sm:$0xff] }
   0x5   :  { %313 = vmatpush1.bf16.msra.mxu0 %v312_v8  ;;  %v318_v16 = vpack.c.bf16 %v43_v14, %v41_v13  ;;  %v42_v18 = vld [vmem:[%s661_s2 + $0x50] sm:$0xff]  ;;  %v45_v19 = vld [vmem:[%s661_s2 + $0x68] sm:$0xff]  ;;  %v47_v20 = vld [vmem:[%s661_s2 + $0x78] sm:$0xff] }
   0x6   :  { %315 = vmatprep.subr.bf16.mxu0 %v314_v12  ;;  %v320_v21 = vpack.c.bf16 %v42_v18, %v40_v17  ;;  %v322_v22 = vpack.c.bf16 %v47_v20, %v45_v19  ;;  %v44_v23 = vld [vmem:[%s661_s2 + $0x60] sm:$0xff]  ;;  %v46_v24 = vld [vmem:[%s661_s2 + $0x70] sm:$0xff]  ;;  %v49_v25 = vld [vmem:[%s661_s2 + $0x88] sm:$0xff] }
   0x7   :  { %v51_v26 = vld [vmem:[%s661_s2 + $0x98] sm:$0xff]  ;;  %v48_v27 = vld [vmem:[%s661_s2 + $0x80] sm:$0xff]  ;;  %v50_v28 = vld [vmem:[%s661_s2 + $0x90] sm:$0xff]  ;;  %v324_v31 = vpack.c.bf16 %v46_v24, %v44_v23 }
   0x8   :  { %v165_v29 = vld [vmem:[%s663_s4 + $0x80] sm:$0xff]  ;;  %v166_v30 = vld [vmem:[%s663_s4 + $0x88] sm:$0xff]  ;;  %v167_v36 = vld [vmem:[%s663_s4 + $0x90] sm:$0xff]  ;;  %v326_v37 = vpack.c.bf16 %v51_v26, %v49_v25  ;;  %v328_v48 = vpack.c.bf16 %v50_v28, %v48_v27 }
   0x9   :  { %317 = vmatpush1.bf16.msra.mxu0 %v316_v15  ;;  %v53_v32 = vld [vmem:[%s661_s2 + $0xa8] sm:$0xff]  ;;  %v342_v33 = vpack.c.bf16 %v166_v30, %v165_v29  ;;  %v149_v34 = vld [vmem:[%s663_s4] sm:$0xff]  ;;  %v168_v39 = vld [vmem:[%s663_s4 + $0x98] sm:$0xff] }
   0xa   :  { %319 = vmatprep.subr.bf16.mxu0 %v318_v16  ;;  %v150_v35 = vld [vmem:[%s663_s4 + $0x8] sm:$0xff]  ;;  %v151_v40 = vld [vmem:[%s663_s4 + $0x10] sm:$0xff]  ;;  %v152_v41 = vld [vmem:[%s663_s4 + $0x18] sm:$0xff]  ;;  %v346_v43 = vpack.c.bf16 %v168_v39, %v167_v36 }
   0xb   :  { %v344_v38 = vpack.c.bf16 %v150_v35, %v149_v34  ;;  %v55_v42 = vld [vmem:[%s661_s2 + $0xb8] sm:$0xff]  ;;  %343 = vmatprep.subr.bf16.mxu1 %v342_v33  ;;  %v169_v44 = vld [vmem:[%s663_s4 + $0xa0] sm:$0xff]  ;;  %v170_v45 = vld [vmem:[%s663_s4 + $0xa8] sm:$0xff]  ;;  %v348_v47 = vpack.c.bf16 %v152_v41, %v151_v40 }
   0xc   :  { %v52_v46 = vld [vmem:[%s661_s2 + $0xa0] sm:$0xff]  ;;  %v54_v49 = vld [vmem:[%s661_s2 + $0xb0] sm:$0xff]  ;;  %v350_v50 = vpack.c.bf16 %v170_v45, %v169_v44  ;;  %v154_v52 = vld [vmem:[%s663_s4 + $0x28] sm:$0xff]  ;;  %v330_v53 = vpack.c.bf16 %v55_v42, %v53_v32 }
   0xd   :  { %321 = vmatpush1.bf16.msra.mxu0 %v320_v21  ;;  %345 = vmatpush3.bf16.msra.mxu1 %v344_v38  ;;  %v153_v51 = vld [vmem:[%s663_s4 + $0x20] sm:$0xff]  ;;  %v171_v54 = vld [vmem:[%s663_s4 + $0xb0] sm:$0xff]  ;;  %v172_v55 = vld [vmem:[%s663_s4 + $0xb8] sm:$0xff] }
   0xe   :  { %323 = vmatprep.subr.bf16.mxu0 %v322_v22  ;;  %347 = vmatprep.subr.bf16.mxu1 %v346_v43 }
  0x11   :  { %325 = vmatpush1.bf16.msra.mxu0 %v324_v31 }
  0x12   :  { %327 = vmatprep.subr.bf16.mxu0 %v326_v37 }
  0x13   :  { %11 = vsyncpa [#allocation3], 0  ;;  %v57_v56 = vld [vmem:[%s661_s2 + $0xc8] sm:$0xff]  ;;  %v59_v57 = vld [vmem:[%s661_s2 + $0xd8] sm:$0xff]  ;;  %349 = vmatpush3.bf16.msra.mxu1 %v348_v47  ;;  %v352_v58 = vpack.c.bf16 %v154_v52, %v153_v51  ;;  %v332_v59 = vpack.c.bf16 %v54_v49, %v52_v46  ;;  %v354_v60 = vpack.c.bf16 %v172_v55, %v171_v54  ;;  %vm30_vm0 = vcmask 523264  }
  0x14   :  { %351 = vmatprep.subr.bf16.mxu1 %v350_v50  ;;  %v155_v61 = vld [vmem:[%s663_s4 + $0x30] sm:$0xff]  ;;  %v156_v62 = vld [vmem:[%s663_s4 + $0x38] sm:$0xff]  ;;  %v334_v63 = vpack.c.bf16 %v59_v57, %v57_v56  ;;  %v56_v0 = vld [vmem:[%s661_s2 + $0xc0] sm:$0xff]  ;;  %v66_v37 = vlaneseq  ;;  %vm258_vm1 = vcmask 130048  }
  0x15   :  { %329 = vmatpush1.bf16.msra.mxu0 %v328_v48  ;;  %v58_v1 = vld [vmem:[%s661_s2 + $0xd0] sm:$0xff]  ;;  %v61_v2 = vld [vmem:[%s661_s2 + $0xe8] sm:$0xff]  ;;  %v63_v3 = vld [vmem:[%s661_s2 + $0xf8] sm:$0xff]  ;;  %v356_v4 = vpack.c.bf16 %v156_v62, %v155_v61 }
  0x16   :  { %331 = vmatprep.subr.bf16.mxu0 %v330_v53  ;;  %v336_v5 = vpack.c.bf16 %v58_v1, %v56_v0  ;;  %v338_v6 = vpack.c.bf16 %v63_v3, %v61_v2  ;;  %v60_v7 = vld [vmem:[%s661_s2 + $0xe0] sm:$0xff]  ;;  %v62_v8 = vld [vmem:[%s661_s2 + $0xf0] sm:$0xff]  ;;  %v174_v14 = vld [vmem:[%s663_s4 + $0xc8] sm:$0xff]  ;;  %v67_v38 = vshrl.u32 %v66_v37, 7 }
  0x17   :  { %353 = vmatpush3.bf16.msra.mxu1 %v352_v58  ;;  %v340_v9 = vpack.c.bf16 %v62_v8, %v60_v7  ;;  %v24_v10 = vld [vmem:[%s659_s0] sm:$0xff]  ;;  %v158_v17 = vld [vmem:[%s663_s4 + $0x48] sm:$0xff]  ;;  %v175_v19 = vld [vmem:[%s663_s4 + $0xd0] sm:$0xff] }
  0x18   :  { %355 = vmatprep.subr.bf16.mxu1 %v354_v60  ;;  %v173_v13 = vld [vmem:[%s663_s4 + $0xc0] sm:$0xff]  ;;  %v176_v20 = vld [vmem:[%s663_s4 + $0xd8] sm:$0xff]  ;;  %v159_v22 = vld [vmem:[%s663_s4 + $0x50] sm:$0xff]  ;;  %v68_v39 = vsub.s32 0, %v67_v38  ;;  %v72_v41 = vsub.s32 1, %v67_v38 }
  0x19   :  { %333 = vmatpush1.bf16.msra.mxu0 %v332_v59  ;;  %v358_v15 = vpack.c.bf16 %v174_v14, %v173_v13  ;;  %v157_v16 = vld [vmem:[%s663_s4 + $0x40] sm:$0xff]  ;;  %v362_v21 = vpack.c.bf16 %v176_v20, %v175_v19  ;;  %v160_v23 = vld [vmem:[%s663_s4 + $0x58] sm:$0xff]  ;;  %v178_v26 = vld [vmem:[%s663_s4 + $0xe8] sm:$0xff] }
  0x1a   :  { %335 = vmatprep.subr.bf16.mxu0 %v334_v63  ;;  %v360_v18 = vpack.c.bf16 %v158_v17, %v157_v16  ;;  %v364_v24 = vpack.c.bf16 %v160_v23, %v159_v22  ;;  %v177_v25 = vld [vmem:[%s663_s4 + $0xe0] sm:$0xff]  ;;  %v162_v29 = vld [vmem:[%s663_s4 + $0x68] sm:$0xff]  ;;  %v179_v30 = vld [vmem:[%s663_s4 + $0xf0] sm:$0xff] }
  0x1b   :  { %357 = vmatpush3.bf16.msra.mxu1 %v356_v4  ;;  %v161_v27 = vld [vmem:[%s663_s4 + $0x60] sm:$0xff]  ;;  %v366_v28 = vpack.c.bf16 %v178_v26, %v177_v25  ;;  %v180_v31 = vld [vmem:[%s663_s4 + $0xf8] sm:$0xff]  ;;  %v163_v34 = vld [vmem:[%s663_s4 + $0x70] sm:$0xff] }
  0x1c   :  { %359 = vmatprep.subr.bf16.mxu1 %v358_v15  ;;  %v368_v32 = vpack.c.bf16 %v162_v29, %v161_v27  ;;  %v370_v33 = vpack.c.bf16 %v180_v31, %v179_v30  ;;  %v164_v35 = vld [vmem:[%s663_s4 + $0x78] sm:$0xff]  ;;  %v64_v40 = vld [vmem:[%s662_s3] sm:$0x3]  ;;  %s407_s3 = smov [#allocation2]  }
  0x1d   :  { %337 = vmatpush1.bf16.msra.mxu0 %v336_v5  ;;  %v372_v36 = vpack.c.bf16 %v164_v35, %v163_v34  ;;  %v69_v42 = vrot.slane %v64_v40, %v68_v39  ;;  %v73_v43 = vrot.slane %v64_v40, %v72_v41  ;;  %v274_v51 = vld [vmem:[%s664_s5] ss:$0 sm:$0xff]  ;;  %s266_s0 = sshll.u32 %s407_s3, 4  ;;  %s267_s0 = int_to_ptr.vmem [resolvable:$true] %s266_s0 }
  0x1e   :  { %339 = vmatprep.subr.bf16.mxu0 %v338_v6  ;;  %s381_s29 = scalar_lea.vmem %s267_s0, 128  ;;  %p386_p1 = scmp.lt.s32.totalorder %s267_s0, %s267_s0 }
  0x1f   :  { %361 = vmatpush3.bf16.msra.mxu1 %v360_v18  ;;  %p382_p0 = scmp.ne.s32.totalorder %s267_s0, %s381_s29  ;;  %p387_p2 = scmp.lt.s32.totalorder %s381_s29, %s381_s29 }
  0x20   :  { %363 = vmatprep.subr.bf16.mxu1 %v362_v21 }
  0x21   :  { %341 = vmatpush1.bf16.msra.mxu0 %v340_v9  ;;  %p388_p3 = por %p387_p2, %p386_p1 }
  0x23   :  { %365 = vmatpush3.bf16.msra.mxu1 %v364_v24  ;;  %p389_p4 = pnand %p388_p3, %p382_p0 }
  0x24   :  { %367 = vmatprep.subr.bf16.mxu1 %v366_v28 }
  0x27   :  { %369 = vmatpush3.bf16.msra.mxu1 %v368_v32 }
  0x28   :  { %371 = vmatprep.subr.bf16.mxu1 %v370_v33 }
  0x2b   :  { %373 = vmatpush3.bf16.msra.mxu1 %v372_v36 }
  0x74   :  { %v28_v11 = vpop.permute.xlu0 %27 }
  0x75   :  { %v31_v12 = vsel %vm30_vm0, %v24_v10, %v28_v11 }
  0x76   :  { %141 = vmatmul.mubr.f32.vlgmr.msra.gmra.mrb[0].mxu0 %v31_v12 }
 0x149   :  { %v142_v44 = vpop.f32.mrb[0].mxu0 }
 0x14a   :  { %v143_v45 = vadd.f32 %v142_v44, %v69_v42  ;;  %v144_v46 = vpop.f32.mrb[1].mxu0 }
 0x14b   :  { %v145_v47 = vadd.f32 %v144_v46, %v73_v43 }
 0x14d   :  { %377 = vtanh.f32 %v145_v47 }
 0x14e   :  { %379 = vtanh.f32 %v143_v45 }
 0x157   :  { %v378_v48 = vpop.eup %377 }
 0x158   :  { %v380_v49 = vpop.eup %379  ;;  %252 = vmatprep.mubr.f32.mxu1 %v378_v48 }
 0x159   :  { %253 = vmatmul.mubr.f32.vlgmr.msra.gmra.mrb[0].mxu1 %v380_v49 }
 0x22c   :  { %v307_v50 = vpop.f32.mrb[0].mxu1 }
 0x22d   :  { %v308_v52 = vpop.f32.mrb[1].mxu1 }
 0x22e   :  { %v309_v53 = vadd.f32 %v308_v52, %v307_v50 }
 0x230   :  { %v255_v54 = vadd.f32 %v309_v53, %v274_v51 }
 0x232   :  { %259 = vst.msk [vmem:[#allocation2] sm:$0xff] %vm258_vm1, %v255_v54 }
 0x233   :  { %392 = shalt.err (!%p389_p4)
}
 0x234   :  { %s393_s1 = scalar_lea.hbm %s665_s6, 128 }
 0x235   :  { %p394_p5 = scmp.ne.s32.totalorder %s665_s6, %s393_s1  ;;  %p397_p6 = scmp.lt.u32.totalorder %s393_s1, %s665_s6 }
 0x237   :  { %p399_p7 = pnand %p397_p6, %p394_p5 }
 0x239   :  { %402 = shalt.err (!%p399_p7)
}
 0x23a   :  { %269 = dma.vmem_to_hbm [thread:$0]  %s267_s0, 128, %s665_s6, [#allocation3]  }
 0x23b   :  { %403 = dma.done.wait [#allocation3], 128  }
 0x23c   :  { %404 = vsyncadd [#allocation3], 4294967168 }
 0x23d   :  { %273 = vsyncpa [#allocation3], 1 }

</bundles_post_ra>
